<compile_context>
chip_gen: v5e
topology: v5e:2x2
jax: 0.10.0
libtpu: 0.0.40
codegen_flags: <defaults>
</compile_context>

<pallas_src>
import jax
import jax.numpy as jnp
from jax.experimental import pallas as pl
from jax.experimental.pallas import tpu as pltpu

_TARGET_BLOCK_BYTES = 4 * 1024 * 1024   # ~4 MiB/block; x4 (in+out, double buffered) = 16 MiB
_VMEM_LIMIT_BYTES = 48 * 1024 * 1024    # explicit, portable (v5e default scoped VMEM is only 16 MiB)
_BLOCK_ELEMS_1D = 1 << 20               # 1-D fallback block: 1M elems (4 MiB f32), multiple of 1024


def _cdiv(a: int, b: int) -> int:
    return -(-a // b)


def _round_up(a: int, b: int) -> int:
    return _cdiv(a, b) * b


def _hswish_kernel(x_ref, o_ref):
    # Compute in f32 regardless of input dtype, cast once at the store.
    x = x_ref[...].astype(jnp.float32)
    r6 = jnp.clip(x + 3.0, 0.0, 6.0)          # relu6(x + 3)
    o_ref[...] = (x * r6 * (1.0 / 6.0)).astype(o_ref.dtype)


def _choose_tile_rows(rows: int, lane: int, itemsize: int) -> int:
    """Pick block-row count: ~_TARGET_BLOCK_BYTES per block, >=2 (even) grid steps."""
    sublane_min = {4: 8, 2: 16, 1: 32}.get(itemsize, 8)   # packed-dtype sublane floor
    tm_cap = max(sublane_min,
                 (_TARGET_BLOCK_BYTES // (lane * itemsize)) // sublane_min * sublane_min)
    if rows <= 2 * sublane_min:
        return rows                     # tiny tensor: one full-extent block is fine
    # At least two blocks so v7x's second TensorCore gets work.
    tm = min(tm_cap, _round_up(_cdiv(rows, 2), sublane_min))
    steps = _cdiv(rows, tm)
    if steps > 2 and steps % 2 == 1:
        # Prefer an even number of grid steps (no straggler block on one core).
        tm_alt = _round_up(_cdiv(rows, steps + 1), sublane_min)
        if tm_alt >= sublane_min and _cdiv(rows, tm_alt) % 2 == 0:
            tm = tm_alt
    return tm


def hswish(x: jax.Array, *, donate: bool = False) -> jax.Array:
    """Elementwise hard-swish matching torch: x * relu6(x + 3) / 6."""
    orig_shape = x.shape
    orig_dtype = x.dtype
    n = x.size
    if n == 0:
        return x

    itemsize = jnp.dtype(orig_dtype).itemsize
    io_alias = {0: 0} if donate else {}
    compiler_params = pltpu.CompilerParams(
        dimension_semantics=("parallel",),
        vmem_limit_bytes=_VMEM_LIMIT_BYTES,
    )

    # Fast path: flatten to a lane-dense (rows, lane) slab with a free reshape.
    lane = next((l for l in (512, 256, 128) if n % l == 0), None)
    if lane is not None:
        rows = n // lane
        tm = _choose_tile_rows(rows, lane, itemsize)
        grid = (_cdiv(rows, tm),)
        out2 = pl.pallas_call(
            _hswish_kernel,
            out_shape=jax.ShapeDtypeStruct((rows, lane), orig_dtype),
            grid_spec=pltpu.PrefetchScalarGridSpec(
                num_scalar_prefetch=0,
                grid=grid,
                in_specs=[pl.BlockSpec((tm, lane), lambda i: (i, 0))],
                out_specs=pl.BlockSpec((tm, lane), lambda i: (i, 0)),
            ),
            compiler_params=compiler_params,
            input_output_aliases=io_alias,
        )(x.reshape(rows, lane))
        return out2.reshape(orig_shape)

    # Fallback (size not divisible by any lane-dense width): run directly on the
    # flat 1-D vector -- no pad, no slice, hence no extra HBM passes. Small
    # tensors use a full-extent block; large ones use 128-multiple blocks and
    # Pallas masks the ragged last block.
    xf = x.reshape(-1)
    blk = n if n <= _BLOCK_ELEMS_1D else _BLOCK_ELEMS_1D
    grid = (_cdiv(n, blk),)
    out1 = pl.pallas_call(
        _hswish_kernel,
        out_shape=jax.ShapeDtypeStruct((n,), orig_dtype),
        grid_spec=pltpu.PrefetchScalarGridSpec(
            num_scalar_prefetch=0,
            grid=grid,
            in_specs=[pl.BlockSpec((blk,), lambda i: (i,))],
            out_specs=pl.BlockSpec((blk,), lambda i: (i,)),
        ),
        compiler_params=compiler_params,
        input_output_aliases=io_alias,
    )(xf)
    return out1.reshape(orig_shape)


def _hswish_ref(x):
    xf = x.astype(jnp.float32)
    return (xf * jnp.clip(xf + 3.0, 0.0, 6.0) / 6.0).astype(x.dtype)


if __name__ == "__main__":
    key = jax.random.PRNGKey(0)

    # NCHW conv activation, lane-divisible path (2*4*16*16 = 2048 = 4 * 512).
    x = jax.random.normal(key, (2, 4, 16, 16), dtype=jnp.float32) * 4.0
    y = hswish(x)
    jax.block_until_ready(y)
    assert y.shape == x.shape and y.dtype == x.dtype
    assert jnp.allclose(y, _hswish_ref(x), atol=1e-6, rtol=1e-5), "f32 mismatch vs reference"

    # Odd-sized tensor -> flat 1-D path (no pad / no slice).
    x_odd = jax.random.normal(jax.random.PRNGKey(1), (3, 5, 7, 11), dtype=jnp.float32) * 4.0
    y_odd = hswish(x_odd)
    jax.block_until_ready(y_odd)
    assert jnp.allclose(y_odd, _hswish_ref(x_odd), atol=1e-6, rtol=1e-5), "odd-size mismatch"

    # bf16 path (f32 compute inside the kernel, single downcast at the store).
    x_bf = x.astype(jnp.bfloat16)
    y_bf = hswish(x_bf)
    jax.block_until_ready(y_bf)
    assert y_bf.dtype == jnp.bfloat16
    assert jnp.allclose(y_bf.astype(jnp.float32), _hswish_ref(x_bf).astype(jnp.float32),
                        atol=2e-2, rtol=2e-2), "bf16 mismatch vs reference"

    # Donated-buffer path (input_output_aliases={0: 0}); reference computed first.
    x_don = jax.random.normal(jax.random.PRNGKey(2), (2, 4, 16, 16), dtype=jnp.float32) * 4.0
    ref_don = _hswish_ref(x_don)
    y_don = hswish(x_don, donate=True)
    jax.block_until_ready(y_don)
    assert jnp.allclose(y_don, ref_don, atol=1e-6, rtol=1e-5), "donate-path mismatch"

    print("KERNEL_OK")
</pallas_src>

<mosaic_0001>
module attributes {stable_mosaic.version = 11 : i64} {
  func.func @_hswish_kernel(%arg0: i32, %arg1: memref<4x512xf32, #tpu.memory_space<vmem>>, %arg2: memref<4x512xf32, #tpu.memory_space<vmem>>) attributes {dimension_semantics = [#tpu.dimension_semantics<parallel>], iteration_bounds = array<i64: 1>, scalar_prefetch = 0 : i64, scratch_operands = 0 : i64, tpu.core_type = #tpu.core_type<tc>, window_params = [{transform_indices = @transform_0, window_bounds = array<i64: 4, 512>}, {transform_indices = @transform_1, window_bounds = array<i64: 4, 512>}]} {
    %c0 = arith.constant 0 : index
    %c0_0 = arith.constant 0 : index
    %0 = vector.load %arg1[%c0, %c0_0] : memref<4x512xf32, #tpu.memory_space<vmem>>, vector<4x512xf32>
    %cst = arith.constant 3.000000e+00 : f32
    %1 = vector.broadcast %cst : f32 to vector<4x512xf32>
    %2 = arith.addf %0, %1 : vector<4x512xf32>
    %cst_1 = arith.constant 0.000000e+00 : f32
    %cst_2 = arith.constant 6.000000e+00 : f32
    %3 = vector.broadcast %cst_1 : f32 to vector<4x512xf32>
    %4 = arith.maximumf %3, %2 : vector<4x512xf32>
    %5 = vector.broadcast %cst_2 : f32 to vector<4x512xf32>
    %6 = arith.minimumf %5, %4 : vector<4x512xf32>
    %7 = arith.mulf %0, %6 : vector<4x512xf32>
    %cst_3 = arith.constant 0.166666672 : f32
    %8 = vector.broadcast %cst_3 : f32 to vector<4x512xf32>
    %9 = arith.mulf %7, %8 : vector<4x512xf32>
    %c0_4 = arith.constant 0 : index
    %c0_5 = arith.constant 0 : index
    %10 = vector.load %arg2[%c0_4, %c0_5] : memref<4x512xf32, #tpu.memory_space<vmem>>, vector<4x512xf32>
    tpu.vector_store %arg2[%c0_4, %c0_5], %9 {strides = array<i32>} : memref<4x512xf32, #tpu.memory_space<vmem>>, vector<4x512xf32>,
    return
  }
  func.func @transform_0(%arg0: i32) -> (i32, i32) {
    %c0_i32 = arith.constant 0 : i32
    %c0_i32_0 = arith.constant 0 : i32
    return %arg0, %c0_i32 : i32, i32
  }
  func.func @transform_1(%arg0: i32) -> (i32, i32) {
    %c0_i32 = arith.constant 0 : i32
    %c0_i32_0 = arith.constant 0 : i32
    return %arg0, %c0_i32 : i32, i32
  }
}

</mosaic_0001>

<bundles_post_ra>
// kernel: tpu_custom_call.1
= control target key start
LH: loop header
LB: loop body
LE: loop exit
PB: predicated region body
PF: predicated region fallthrough
CT: control target
= control target key end

     0   :  { %6 = vsyncpa [#allocation3], 0  ;;  %s126_s0 = inlined_call_operand.hbm [shape: f32[4,512], index: 0, kind: input, shape index: {}]   ;;  %s127_s1 = inlined_call_operand.hbm [shape: f32[4,512], index: 1, kind: output, shape index: {}]  }
   0x1   :  { %7 = vsyncpa [#allocation4], 0  ;;  %s13_s8 = sshll.u32 %s126_s0, 4  ;;  %s108_s9 = smov [#allocation2]   ;;  %s14_s8 = int_to_ptr.hbm [resolvable:$true] %s13_s8 }
   0x2   :  { %s15_s10 = sshll.u32 %s108_s9, 4  ;;  %s16_s10 = int_to_ptr.vmem [resolvable:$true] %s15_s10 }
   0x3   :  { %18 = dma.hbm_to_vmem [thread:$0]  %s14_s8, 256, %s16_s10, [#allocation3]  }
   0x4   :  { %104 = dma.done.wait [#allocation3], 256  }
   0x5   :  { %105 = vsyncadd [#allocation3], 4294967040  ;;  %v23_v0 = vld [vmem:[#allocation2] sm:$0xff]  ;;  %v24_v1 = vld [vmem:[#allocation2 + $0x8] sm:$0xff]  ;;  %s109_s11 = smov [#allocation5]   ;;  %s44_s14 = sshll.u32 %s127_s1, 4  ;;  %s45_s14 = int_to_ptr.hbm [resolvable:$true] %s44_s14 }
   0x6   :  { %v25_v2 = vadd.f32 3.0, %v23_v0  ;;  %v26_v3 = vadd.f32 3.0, %v24_v1  ;;  %s42_s12 = sshll.u32 %s109_s11, 4  ;;  %s43_s12 = int_to_ptr.vmem [resolvable:$true] %s42_s12 }
   0x8   :  { %v27_v4 = vmax.f32 %v25_v2, 0.0  ;;  %v28_v5 = vmax.f32 %v26_v3, 0.0 }
   0xa   :  { %v29_v6 = vmin.f32 %v27_v4, 6.0  ;;  %v30_v7 = vmin.f32 %v28_v5, 6.0 }
   0xc   :  { %v31_v8 = vmul.f32 %v29_v6, %v23_v0  ;;  %v32_v9 = vmul.f32 %v30_v7, %v24_v1 }
   0xe   :  { %v33_v10 = vmul.f32 0.16666667, %v31_v8  ;;  %v34_v11 = vmul.f32 0.16666667, %v32_v9 }
  0x10   :  { %35 = vst [vmem:[#allocation5] sm:$0xff] %v33_v10 }
  0x11   :  { %36 = vst [vmem:[#allocation5 + $0x8] sm:$0xff] %v34_v11 }
  0x12   :  { %47 = dma.vmem_to_hbm [thread:$0]  %s43_s12, 256, %s45_s14, [#allocation4]  }
  0x13   :  { %106 = dma.done.wait [#allocation4], 256  }
  0x14   :  { %107 = vsyncadd [#allocation4], 4294967040 }
  0x15   :  { %52 = vsyncpa [#allocation3], 1 }
  0x16   :  { %53 = vsyncpa [#allocation4], 1 }

</bundles_post_ra>
